<compile_context>
chip_gen: v7x
topology: tpu7x:2x2x1
jax: 0.10.0
libtpu: 0.0.40
codegen_flags: <defaults>
</compile_context>

<pallas_src>
import jax
import jax.numpy as jnp
from jax.experimental import pallas as pl
from jax.experimental.pallas import tpu as pltpu

IN_FEATURES = 400
HIDDEN = 2
HIDDEN_PAD = 8          # hidden dim zero-padded to one native sublane tile
OUT_FEATURES = 2
TILE_B_MAX = 4096       # rows per grid step (2 x 8 MiB double-buffered x in VMEM)


def _round_up(n, m):
    return ((n + m - 1) // m) * m


def mlp_kernel(x_ref, w1_ref, scal_ref, o_ref):
    """One batch tile.

    x_ref   : (TILE_B, 400)        VMEM  input rows
    w1_ref  : (400, HIDDEN_PAD)    VMEM  fc1.weight.T, hidden cols zero-padded 2 -> 8
    scal_ref: (5,)                 SMEM  [b1_0, b1_1, dw0, dw1, db]  (fc2/softmax fold)
    o_ref   : (2, TILE_B)          VMEM  row 0 = softmax[:, 0], row 1 = softmax[:, 1]
    """
    # ---- fc1 on the MXU, f32 accumulate --------------------------------------
    h = jnp.dot(x_ref[...], w1_ref[...], preferred_element_type=jnp.float32)  # (TILE_B, 8)

    # ---- batch -> lane axis ---------------------------------------------------
    # The rest of the epilogue runs lane-dense on (1, TILE_B) rows and the output
    # store is an unmasked lane-dense block instead of TILE_B/8 masked column stores.
    hT = h.T                                                                   # (8, TILE_B)

    # bias + ReLU (scalars broadcast from SMEM)
    h0 = jnp.maximum(hT[0:1, :] + scal_ref[0], 0.0)                            # (1, TILE_B)
    h1 = jnp.maximum(hT[1:2, :] + scal_ref[1], 0.0)

    # fc2 + 2-class softmax folded into a single logit difference:
    #   d = logit0 - logit1 ;  softmax0 = sigmoid(d) ;  softmax1 = 1 - softmax0
    d = h0 * scal_ref[2] + h1 * scal_ref[3] + scal_ref[4]

    # Exact sigmoid.  After the transpose this touches only ~TILE_B/128 vregs, so the
    # exact divide is negligible; pl.reciprocal(..., approx=True) would move it to the
    # EUP at ~1e-3 accuracy if ever needed.
    p0 = 1.0 / (1.0 + jnp.exp(-d))                                             # (1, TILE_B)

    # Two lane-dense row stores.
    o_ref[0:1, :] = p0.astype(o_ref.dtype)
    o_ref[1:2, :] = (1.0 - p0).astype(o_ref.dtype)


def simple_nn_forward(x, w1, b1, w2, b2):
    """Forward pass of SimpleNN: softmax(fc2(relu(fc1(x))), dim=1).  Returns (B, 2)."""
    B = x.shape[0]
    x = x.astype(jnp.float32)
    b1 = b1.reshape(-1).astype(jnp.float32)

    # fc1 weights with the hidden dim zero-padded to 8 (padded columns never read back).
    w1p = jnp.zeros((IN_FEATURES, HIDDEN_PAD), jnp.float32)
    w1p = w1p.at[:, :HIDDEN].set(w1.astype(jnp.float32))

    # fc2 + softmax folded into 5 SMEM scalars: [b1_0, b1_1, dw0, dw1, db].
    dw = (w2[:, 0] - w2[:, 1]).astype(jnp.float32).reshape(HIDDEN)
    db = (b2[0] - b2[1]).astype(jnp.float32).reshape(1)
    scal = jnp.concatenate([b1[:HIDDEN], dw, db])                              # (5,)

    # ---- batch tiling ---------------------------------------------------------
    # Sublane-align the batch and keep the lane dim of the (2, bp) output at least one
    # full vreg row wide; tiny pads are computed and sliced off afterwards.
    bp = max(_round_up(B, 8), 128)
    if bp > TILE_B_MAX:
        tile_b = TILE_B_MAX                     # multiple of 128; ragged tail is masked
    elif bp >= 1024 and (bp // 2) % 128 == 0:
        tile_b = bp // 2                        # >=2 grid steps so v7x's 2nd TC gets work
    else:
        tile_b = bp
    if bp != B:
        x = jnp.pad(x, ((0, bp - B), (0, 0)))
    grid = (pl.cdiv(bp, tile_b),)

    cost = pl.CostEstimate(
        flops=2 * bp * IN_FEATURES * HIDDEN + 8 * bp,
        transcendentals=bp,                     # one exp per row
        bytes_accessed=bp * IN_FEATURES * 4 + bp * OUT_FEATURES * 4
        + IN_FEATURES * HIDDEN_PAD * 4 + 5 * 4,
    )

    out_t = pl.pallas_call(
        mlp_kernel,
        out_shape=jax.ShapeDtypeStruct((OUT_FEATURES, bp), jnp.float32),
        grid_spec=pltpu.PrefetchScalarGridSpec(
            num_scalar_prefetch=0,
            grid=grid,
            in_specs=[
                # x: tiled along the batch axis -> double-buffered DMA per step.
                pl.BlockSpec((tile_b, IN_FEATURES), lambda i: (i, 0)),
                # fc1 weights: constant index map -> VMEM-resident across steps.
                pl.BlockSpec((IN_FEATURES, HIDDEN_PAD), lambda i: (0, 0)),
                # folded fc1-bias / fc2 / softmax scalars in SMEM.
                pl.BlockSpec(memory_space=pltpu.MemorySpace.SMEM),
            ],
            # Lane-dense output: (2, tile_b) blocks along the lane axis.
            out_specs=pl.BlockSpec((OUT_FEATURES, tile_b), lambda i: (0, i)),
        ),
        compiler_params=pltpu.CompilerParams(
            dimension_semantics=("parallel",),          # no reduction axis
            vmem_limit_bytes=32 * 1024 * 1024,          # legal on v5e/v6e/v7x; ~19 MiB used
        ),
        cost_estimate=cost,
    )(x, w1p, scal)

    # Tiny (2, B) -> (B, 2) relayout outside the kernel.
    return out_t[:, :B].T


def init_params(key):
    # Deterministic init mimicking nn.Linear default: U(-1/sqrt(fan_in), +1/sqrt(fan_in)).
    k1, k2, k3, k4 = jax.random.split(key, 4)
    bound1 = 1.0 / jnp.sqrt(float(IN_FEATURES))
    bound2 = 1.0 / jnp.sqrt(float(HIDDEN))
    w1 = jax.random.uniform(k1, (IN_FEATURES, HIDDEN), jnp.float32, -bound1, bound1)   # fc1.weight.T
    b1 = jax.random.uniform(k2, (HIDDEN,), jnp.float32, -bound1, bound1)               # fc1.bias
    w2 = jax.random.uniform(k3, (HIDDEN, OUT_FEATURES), jnp.float32, -bound2, bound2)  # fc2.weight.T
    b2 = jax.random.uniform(k4, (OUT_FEATURES,), jnp.float32, -bound2, bound2)         # fc2.bias
    return w1, b1, w2, b2


if __name__ == "__main__":
    key = jax.random.PRNGKey(0)
    kx, kp = jax.random.split(key)
    B = 8
    x = jax.random.normal(kx, (B, IN_FEATURES), jnp.float32)
    w1, b1, w2, b2 = init_params(kp)

    out = jax.block_until_ready(simple_nn_forward(x, w1, b1, w2, b2))

    # Pure-JAX reference (same math as the PyTorch forward).
    h_ref = jnp.maximum(x @ w1 + b1[None, :], 0.0)
    logits_ref = h_ref @ w2 + b2[None, :]
    ref = jax.nn.softmax(logits_ref, axis=1)

    assert out.shape == (B, OUT_FEATURES)
    # 1e-3 covers the default-precision MXU matmul inside the kernel vs the XLA
    # reference matmul; the sigmoid fold of the 2-class softmax is exact in f32.
    assert jnp.allclose(out, ref, atol=1e-3, rtol=1e-3)
    assert jnp.allclose(jnp.sum(out, axis=1), 1.0, atol=1e-5)

    # TODO(synk): self.l2_reg is a training-time (loss) attribute, not part of forward.
    print("KERNEL_OK")
</pallas_src>

<mosaic_0001>
module attributes {stable_mosaic.version = 11 : i64} {
  func.func @mlp_kernel(%arg0: i32, %arg1: memref<128x400xf32, #tpu.memory_space<vmem>>, %arg2: memref<400x8xf32, #tpu.memory_space<vmem>>, %arg3: memref<5xf32, #tpu.memory_space<smem>>, %arg4: memref<2x128xf32, #tpu.memory_space<vmem>>) attributes {dimension_semantics = [#tpu.dimension_semantics<parallel>], iteration_bounds = array<i64: 1>, scalar_prefetch = 0 : i64, scratch_operands = 0 : i64, tpu.core_type = #tpu.core_type<tc>, window_params = [{transform_indices = @transform_0, window_bounds = array<i64: 128, 400>}, {pipeline_mode = #tpu.pipeline_mode<synchronous>, transform_indices = @transform_1, window_bounds = array<i64: 400, 8>}, {transform_indices = @transform_2, window_bounds = array<i64: 5>}, {transform_indices = @transform_3, window_bounds = array<i64: 2, 128>}]} {
    %c0 = arith.constant 0 : index
    %c0_0 = arith.constant 0 : index
    %0 = vector.load %arg1[%c0, %c0_0] : memref<128x400xf32, #tpu.memory_space<vmem>>, vector<128x400xf32>
    %c0_1 = arith.constant 0 : index
    %c0_2 = arith.constant 0 : index
    %1 = vector.load %arg2[%c0_1, %c0_2] : memref<400x8xf32, #tpu.memory_space<vmem>>, vector<400x8xf32>
    %cst = arith.constant dense<0.000000e+00> : vector<128x8xf32>
    %2 = tpu.matmul %0, %1, %cst {dimension_numbers = #tpu.dot_dimension_numbers<[1], [0], [0], [1], [0, 0, 1, 1], [], []>} : vector<128x400xf32>, vector<400x8xf32>, vector<128x8xf32> -> vector<128x8xf32>
    %3 = tpu.transpose %2, [1, 0] : vector<128x8xf32> -> vector<8x128xf32>
    %4 = vector.extract_strided_slice %3 {offsets = [0, 0], sizes = [1, 128], strides = [1, 1]} : vector<8x128xf32> to vector<1x128xf32>
    %c0_3 = arith.constant 0 : index
    %5 = memref.load %arg3[%c0_3] : memref<5xf32, #tpu.memory_space<smem>>
    %6 = vector.broadcast %5 : f32 to vector<1x128xf32>
    %7 = arith.addf %4, %6 : vector<1x128xf32>
    %cst_4 = arith.constant 0.000000e+00 : f32
    %8 = vector.broadcast %cst_4 : f32 to vector<1x128xf32>
    %9 = arith.maximumf %7, %8 : vector<1x128xf32>
    %10 = vector.extract_strided_slice %3 {offsets = [1, 0], sizes = [1, 128], strides = [1, 1]} : vector<8x128xf32> to vector<1x128xf32>
    %c1 = arith.constant 1 : index
    %11 = memref.load %arg3[%c1] : memref<5xf32, #tpu.memory_space<smem>>
    %12 = vector.broadcast %11 : f32 to vector<1x128xf32>
    %13 = arith.addf %10, %12 : vector<1x128xf32>
    %cst_5 = arith.constant 0.000000e+00 : f32
    %14 = vector.broadcast %cst_5 : f32 to vector<1x128xf32>
    %15 = arith.maximumf %13, %14 : vector<1x128xf32>
    %c2 = arith.constant 2 : index
    %16 = memref.load %arg3[%c2] : memref<5xf32, #tpu.memory_space<smem>>
    %17 = vector.broadcast %16 : f32 to vector<1x128xf32>
    %18 = arith.mulf %9, %17 : vector<1x128xf32>
    %c3 = arith.constant 3 : index
    %19 = memref.load %arg3[%c3] : memref<5xf32, #tpu.memory_space<smem>>
    %20 = vector.broadcast %19 : f32 to vector<1x128xf32>
    %21 = arith.mulf %15, %20 : vector<1x128xf32>
    %22 = arith.addf %18, %21 : vector<1x128xf32>
    %c4 = arith.constant 4 : index
    %23 = memref.load %arg3[%c4] : memref<5xf32, #tpu.memory_space<smem>>
    %24 = vector.broadcast %23 : f32 to vector<1x128xf32>
    %25 = arith.addf %22, %24 : vector<1x128xf32>
    %cst_6 = arith.constant 0.000000e+00 : f32
    %26 = vector.broadcast %cst_6 : f32 to vector<1x128xf32>
    %27 = arith.subf %26, %25 : vector<1x128xf32>
    %28 = math.exp %27 : vector<1x128xf32>
    %cst_7 = arith.constant 1.000000e+00 : f32
    %29 = vector.broadcast %cst_7 : f32 to vector<1x128xf32>
    %30 = arith.addf %29, %28 : vector<1x128xf32>
    %cst_8 = arith.constant 1.000000e+00 : f32
    %31 = vector.broadcast %cst_8 : f32 to vector<1x128xf32>
    %32 = arith.divf %31, %30 : vector<1x128xf32>
    %c0_9 = arith.constant 0 : index
    %c0_10 = arith.constant 0 : index
    %33 = vector.load %arg4[%c0_9, %c0_10] : memref<2x128xf32, #tpu.memory_space<vmem>>, vector<1x128xf32>
    tpu.vector_store %arg4[%c0_9, %c0_10], %32 {strides = array<i32>} : memref<2x128xf32, #tpu.memory_space<vmem>>, vector<1x128xf32>,
    %cst_11 = arith.constant 1.000000e+00 : f32
    %34 = vector.broadcast %cst_11 : f32 to vector<1x128xf32>
    %35 = arith.subf %34, %32 : vector<1x128xf32>
    %c1_12 = arith.constant 1 : index
    %c0_13 = arith.constant 0 : index
    %36 = vector.load %arg4[%c1_12, %c0_13] : memref<2x128xf32, #tpu.memory_space<vmem>>, vector<1x128xf32>
    tpu.vector_store %arg4[%c1_12, %c0_13], %35 {strides = array<i32>} : memref<2x128xf32, #tpu.memory_space<vmem>>, vector<1x128xf32>,
    return
  }
  func.func @transform_0(%arg0: i32) -> (i32, i32) {
    %c0_i32 = arith.constant 0 : i32
    %c0_i32_0 = arith.constant 0 : i32
    return %arg0, %c0_i32 : i32, i32
  }
  func.func @transform_1(%arg0: i32) -> (i32, i32) {
    %c0_i32 = arith.constant 0 : i32
    %c0_i32_0 = arith.constant 0 : i32
    %c0_i32_1 = arith.constant 0 : i32
    return %c0_i32, %c0_i32_0 : i32, i32
  }
  func.func @transform_2(%arg0: i32) -> i32 {
    %c0_i32 = arith.constant 0 : i32
    %c0_i32_0 = arith.constant 0 : i32
    return %c0_i32 : i32
  }
  func.func @transform_3(%arg0: i32) -> (i32, i32) {
    %c0_i32 = arith.constant 0 : i32
    %c0_i32_0 = arith.constant 0 : i32
    return %c0_i32, %arg0 : i32, i32
  }
}

</mosaic_0001>

<bundles_post_ra>
// kernel: tpu_custom_call.1
= control target key start
LH: loop header
LB: loop body
LE: loop exit
PB: predicated region body
PF: predicated region fallthrough
CT: control target
= control target key end

     0   :  { %8 = vsyncpa [#allocation4], 0  ;;  %s1167_s0 = inlined_call_operand.vmem [shape: f32[128,400], index: 0, kind: input, shape index: {}]   ;;  %s1168_s1 = inlined_call_operand.vmem [shape: f32[400,8], index: 1, kind: input, shape index: {}]   ;;  %s1169_s2 = inlined_call_operand.vmem [shape: f32[5], index: 2, kind: input, shape index: {}]   ;;  %s1170_s3 = inlined_call_operand.hbm [shape: f32[2,128], index: 3, kind: output, shape index: {}]  }
   0x1   :  { %9 = vsyncpa [#allocation3], 0  ;;  %s20_s14 = sshll.u32 %s1169_s2, 4  ;;  %s21_s14 = int_to_ptr.vmem [resolvable:$true] %s20_s14 }
   0x2   :  { %s724_s15 = scalar_lea.vmem %s21_s14, 16  ;;  %p729_p1 = scmp.lt.s32.totalorder %s21_s14, %s21_s14 }
   0x3   :  { %p725_p0 = scmp.ne.s32.totalorder %s21_s14, %s724_s15  ;;  %p730_p2 = scmp.lt.s32.totalorder %s724_s15, %s724_s15 }
   0x5   :  { %p731_p3 = por %p730_p2, %p729_p1 }
   0x7   :  { %p732_p4 = pnand %p731_p3, %p725_p0 }
   0x9   :  { %735 = shalt.err (!%p732_p4)
}
   0xa   :  { %s762_s16 = smov [#allocation2]  }
   0xb   :  { %23 = dma.vmem_to_smem %s21_s14, 16, %s762_s16, [#allocation4]  }
   0xc   :  { %758 = dma.done.wait [#allocation4], 16  }
   0xd   :  { %759 = vsyncadd [#allocation4], 4294967280 }
   0xe   :  { %27 = sfence }
   0xf   :  { %v108_v0 = vld [vmem:[%s1168_s1 + $0x80] sm:$0xff]  ;;  %v109_v1 = vld [vmem:[%s1168_s1 + $0x88] sm:$0xff]  ;;  %v763_v3 = vmov 0.0|0.0   ;;  %v110_v10 = vld [vmem:[%s1168_s1 + $0x90] sm:$0xff]  ;;  %vm142_vm0 = vcmask 130048   ;;  %s574_s16 = sld [smem:[#allocation2 + $0x1]] }
  0x10   :  { %v124_v2 = vld [vmem:[%s1168_s1 + $0x100] sm:$0xff]  ;;  %690 = vmatprep.subr.bf16.mxu1 %v763_v3  ;;  %v658_v4 = vpack.c.bf16 %v109_v1, %v108_v0  ;;  %v125_v5 = vld [vmem:[%s1168_s1 + $0x108] sm:$0xff]  ;;  %v111_v11 = vld [vmem:[%s1168_s1 + $0x98] sm:$0xff]  ;;  %s576_s17 = sld [smem:[#allocation2 + $0x3]]  ;;  %s575_s18 = sld [smem:[#allocation2 + $0x2]] }
  0x11   :  { %v92_v6 = vld [vmem:[%s1168_s1] sm:$0xff]  ;;  %v93_v7 = vld [vmem:[%s1168_s1 + $0x8] sm:$0xff]  ;;  %v691_v8 = vpack.c.bf16 %v125_v5, %v124_v2  ;;  %v126_v12 = vld [vmem:[%s1168_s1 + $0x110] sm:$0xff]  ;;  %v662_v13 = vpack.c.bf16 %v111_v11, %v110_v10  ;;  %s577_s19 = sld [smem:[#allocation2 + $0x4]]  ;;  %s764_s20 = smov [#allocation5]  }
  0x12   :  { %v660_v9 = vpack.c.bf16 %v93_v7, %v92_v6  ;;  %659 = vmatprep.subr.bf16.mxu0 %v658_v4  ;;  %v127_v14 = vld [vmem:[%s1168_s1 + $0x118] sm:$0xff]  ;;  %v94_v15 = vld [vmem:[%s1168_s1 + $0x10] sm:$0xff]  ;;  %v112_v19 = vld [vmem:[%s1168_s1 + $0xa0] sm:$0xff]  ;;  %s549_s2 = sshll.u32 %s764_s20, 4  ;;  %s550_s2 = int_to_ptr.vmem [resolvable:$true] %s549_s2 }
  0x13   :  { %v95_v16 = vld [vmem:[%s1168_s1 + $0x18] sm:$0xff]  ;;  %692 = vmatpush1.bf16.msra.mxu1 %v691_v8  ;;  %v694_v17 = vpack.c.bf16 %v127_v14, %v126_v12  ;;  %v113_v20 = vld [vmem:[%s1168_s1 + $0xa8] sm:$0xff]  ;;  %v128_v21 = vld [vmem:[%s1168_s1 + $0x120] sm:$0xff]  ;;  %s736_s21 = scalar_lea.vmem %s550_s2, 32  ;;  %p741_p6 = scmp.lt.s32.totalorder %s550_s2, %s550_s2 }
  0x14   :  { %661 = vmatpush3.bf16.msra.mxu0 %v660_v9  ;;  %v664_v18 = vpack.c.bf16 %v95_v16, %v94_v15  ;;  %693 = vmatprep.subr.bf16.mxu1 %v763_v3  ;;  %v666_v22 = vpack.c.bf16 %v113_v20, %v112_v19  ;;  %v129_v23 = vld [vmem:[%s1168_s1 + $0x128] sm:$0xff]  ;;  %v96_v24 = vld [vmem:[%s1168_s1 + $0x20] sm:$0xff]  ;;  %v114_v26 = vld [vmem:[%s1168_s1 + $0xb0] sm:$0xff]  ;;  %p737_p5 = scmp.ne.s32.totalorder %s550_s2, %s736_s21  ;;  %p742_p7 = scmp.lt.s32.totalorder %s736_s21, %s736_s21 }
  0x15   :  { %663 = vmatprep.subr.bf16.mxu0 %v662_v13  ;;  %v97_v25 = vld [vmem:[%s1168_s1 + $0x28] sm:$0xff]  ;;  %v115_v27 = vld [vmem:[%s1168_s1 + $0xb8] sm:$0xff]  ;;  %v697_v28 = vpack.c.bf16 %v129_v23, %v128_v21  ;;  %v130_v30 = vld [vmem:[%s1168_s1 + $0x130] sm:$0xff] }
  0x16   :  { %v668_v29 = vpack.c.bf16 %v97_v25, %v96_v24  ;;  %v670_v31 = vpack.c.bf16 %v115_v27, %v114_v26  ;;  %v131_v32 = vld [vmem:[%s1168_s1 + $0x138] sm:$0xff]  ;;  %v98_v33 = vld [vmem:[%s1168_s1 + $0x30] sm:$0xff]  ;;  %v116_v35 = vld [vmem:[%s1168_s1 + $0xc0] sm:$0xff]  ;;  %p743_p8 = por %p742_p7, %p741_p6 }
  0x17   :  { %695 = vmatpush1.bf16.msra.mxu1 %v694_v17  ;;  %v99_v34 = vld [vmem:[%s1168_s1 + $0x38] sm:$0xff]  ;;  %v117_v36 = vld [vmem:[%s1168_s1 + $0xc8] sm:$0xff]  ;;  %v700_v37 = vpack.c.bf16 %v131_v32, %v130_v30  ;;  %v132_v39 = vld [vmem:[%s1168_s1 + $0x140] sm:$0xff] }
  0x18   :  { %665 = vmatpush3.bf16.msra.mxu0 %v664_v18  ;;  %696 = vmatprep.subr.bf16.mxu1 %v763_v3  ;;  %v672_v38 = vpack.c.bf16 %v99_v34, %v98_v33  ;;  %v674_v40 = vpack.c.bf16 %v117_v36, %v116_v35  ;;  %v133_v41 = vld [vmem:[%s1168_s1 + $0x148] sm:$0xff]  ;;  %v100_v42 = vld [vmem:[%s1168_s1 + $0x40] sm:$0xff]  ;;  %v118_v44 = vld [vmem:[%s1168_s1 + $0xd0] sm:$0xff]  ;;  %p744_p9 = pnand %p743_p8, %p737_p5 }
  0x19   :  { %667 = vmatprep.subr.bf16.mxu0 %v666_v22  ;;  %v101_v43 = vld [vmem:[%s1168_s1 + $0x48] sm:$0xff]  ;;  %v119_v45 = vld [vmem:[%s1168_s1 + $0xd8] sm:$0xff]  ;;  %v703_v46 = vpack.c.bf16 %v133_v41, %v132_v39  ;;  %v134_v48 = vld [vmem:[%s1168_s1 + $0x150] sm:$0xff] }
  0x1a   :  { %v676_v47 = vpack.c.bf16 %v101_v43, %v100_v42  ;;  %v135_v49 = vld [vmem:[%s1168_s1 + $0x158] sm:$0xff]  ;;  %v29_v50 = vld [vmem:[%s1167_s0 + $0x8] sm:$0xff]  ;;  %v678_v51 = vpack.c.bf16 %v119_v45, %v118_v44  ;;  %v102_v52 = vld [vmem:[%s1168_s1 + $0x50] sm:$0xff] }
  0x1b   :  { %698 = vmatpush1.bf16.msra.mxu1 %v697_v28  ;;  %v103_v53 = vld [vmem:[%s1168_s1 + $0x58] sm:$0xff]  ;;  %v120_v55 = vld [vmem:[%s1168_s1 + $0xe0] sm:$0xff]  ;;  %v121_v56 = vld [vmem:[%s1168_s1 + $0xe8] sm:$0xff]  ;;  %255 = vmatprep.mubr.f32.mxu0 %v29_v50  ;;  %v706_v57 = vpack.c.bf16 %v135_v49, %v134_v48 }
  0x1c   :  { %669 = vmatpush3.bf16.msra.mxu0 %v668_v29  ;;  %699 = vmatprep.subr.bf16.mxu1 %v763_v3  ;;  %v31_v54 = vld [vmem:[%s1167_s0 + $0x18] sm:$0xff]  ;;  %v680_v58 = vpack.c.bf16 %v103_v53, %v102_v52  ;;  %v136_v59 = vld [vmem:[%s1168_s1 + $0x160] sm:$0xff]  ;;  %v682_v60 = vpack.c.bf16 %v121_v56, %v120_v55  ;;  %v137_v61 = vld [vmem:[%s1168_s1 + $0x168] sm:$0xff] }
  0x1d   :  { %671 = vmatprep.subr.bf16.mxu0 %v670_v31  ;;  %558 = vmatprep.mubr.msk.f32.mxu1 %vm142_vm0, %v31_v54  ;;  %v104_v62 = vld [vmem:[%s1168_s1 + $0x60] sm:$0xff]  ;;  %v105_v63 = vld [vmem:[%s1168_s1 + $0x68] sm:$0xff]  ;;  %v122_v0 = vld [vmem:[%s1168_s1 + $0xf0] sm:$0xff]  ;;  %v709_v2 = vpack.c.bf16 %v137_v61, %v136_v59 }
  0x1e   :  { %v123_v1 = vld [vmem:[%s1168_s1 + $0xf8] sm:$0xff]  ;;  %v684_v4 = vpack.c.bf16 %v105_v63, %v104_v62  ;;  %v138_v5 = vld [vmem:[%s1168_s1 + $0x170] sm:$0xff]  ;;  %v140_v12 = vld [vmem:[%s1168_s1 + $0x180] sm:$0xff] }
  0x1f   :  { %701 = vmatpush1.bf16.msra.mxu1 %v700_v37  ;;  %v686_v6 = vpack.c.bf16 %v123_v1, %v122_v0  ;;  %v139_v7 = vld [vmem:[%s1168_s1 + $0x178] sm:$0xff]  ;;  %v106_v8 = vld [vmem:[%s1168_s1 + $0x70] sm:$0xff]  ;;  %v141_v13 = vld [vmem:[%s1168_s1 + $0x188] sm:$0xff] }
  0x20   :  { %673 = vmatpush3.bf16.msra.mxu0 %v672_v38  ;;  %702 = vmatprep.subr.bf16.mxu1 %v763_v3  ;;  %v107_v9 = vld [vmem:[%s1168_s1 + $0x78] sm:$0xff]  ;;  %v712_v10 = vpack.c.bf16 %v139_v7, %v138_v5  ;;  %v28_v14 = vld [vmem:[%s1167_s0] sm:$0xff]  ;;  %v715_v15 = vpack.c.bf16 %v141_v13, %v140_v12  ;;  %v33_v16 = vld [vmem:[%s1167_s0 + $0x28] sm:$0xff] }
  0x21   :  { %675 = vmatprep.subr.bf16.mxu0 %v674_v40  ;;  %v688_v11 = vpack.c.bf16 %v107_v9, %v106_v8  ;;  %v30_v17 = vld [vmem:[%s1167_s0 + $0x10] sm:$0xff]  ;;  %v32_v18 = vld [vmem:[%s1167_s0 + $0x20] sm:$0xff]  ;;  %v35_v19 = vld [vmem:[%s1167_s0 + $0x38] sm:$0xff] }
  0x22   :  { %v34_v20 = vld [vmem:[%s1167_s0 + $0x30] sm:$0xff]  ;;  %v36_v21 = vld [vmem:[%s1167_s0 + $0x40] sm:$0xff]  ;;  %v39_v22 = vld [vmem:[%s1167_s0 + $0x58] sm:$0xff] }
  0x23   :  { %704 = vmatpush1.bf16.msra.mxu1 %v703_v46  ;;  %v41_v23 = vld [vmem:[%s1167_s0 + $0x68] sm:$0xff]  ;;  %v38_v24 = vld [vmem:[%s1167_s0 + $0x50] sm:$0xff]  ;;  %v40_v25 = vld [vmem:[%s1167_s0 + $0x60] sm:$0xff] }
  0x24   :  { %677 = vmatpush3.bf16.msra.mxu0 %v676_v47  ;;  %705 = vmatprep.subr.bf16.mxu1 %v763_v3  ;;  %v43_v26 = vld [vmem:[%s1167_s0 + $0x78] sm:$0xff]  ;;  %v45_v27 = vld [vmem:[%s1167_s0 + $0x88] sm:$0xff]  ;;  %v42_v28 = vld [vmem:[%s1167_s0 + $0x70] sm:$0xff] }
  0x25   :  { %679 = vmatprep.subr.bf16.mxu0 %v678_v51  ;;  %v44_v29 = vld [vmem:[%s1167_s0 + $0x80] sm:$0xff]  ;;  %v47_v30 = vld [vmem:[%s1167_s0 + $0x98] sm:$0xff]  ;;  %v49_v31 = vld [vmem:[%s1167_s0 + $0xa8] sm:$0xff] }
  0x26   :  { %v46_v32 = vld [vmem:[%s1167_s0 + $0x90] sm:$0xff]  ;;  %v48_v33 = vld [vmem:[%s1167_s0 + $0xa0] sm:$0xff]  ;;  %v51_v34 = vld [vmem:[%s1167_s0 + $0xb8] sm:$0xff] }
  0x27   :  { %707 = vmatpush1.bf16.msra.mxu1 %v706_v57  ;;  %v53_v35 = vld [vmem:[%s1167_s0 + $0xc8] sm:$0xff]  ;;  %v50_v36 = vld [vmem:[%s1167_s0 + $0xb0] sm:$0xff]  ;;  %v52_v37 = vld [vmem:[%s1167_s0 + $0xc0] sm:$0xff] }
  0x28   :  { %681 = vmatpush3.bf16.msra.mxu0 %v680_v58  ;;  %708 = vmatprep.subr.bf16.mxu1 %v763_v3  ;;  %v55_v38 = vld [vmem:[%s1167_s0 + $0xd8] sm:$0xff]  ;;  %v57_v39 = vld [vmem:[%s1167_s0 + $0xe8] sm:$0xff]  ;;  %v54_v40 = vld [vmem:[%s1167_s0 + $0xd0] sm:$0xff] }
  0x29   :  { %683 = vmatprep.subr.bf16.mxu0 %v682_v60  ;;  %v56_v41 = vld [vmem:[%s1167_s0 + $0xe0] sm:$0xff]  ;;  %v59_v42 = vld [vmem:[%s1167_s0 + $0xf8] sm:$0xff]  ;;  %v61_v43 = vld [vmem:[%s1167_s0 + $0x108] sm:$0xff] }
  0x2a   :  { %v58_v44 = vld [vmem:[%s1167_s0 + $0xf0] sm:$0xff]  ;;  %v60_v45 = vld [vmem:[%s1167_s0 + $0x100] sm:$0xff]  ;;  %v63_v46 = vld [vmem:[%s1167_s0 + $0x118] sm:$0xff] }
  0x2b   :  { %710 = vmatpush1.bf16.msra.mxu1 %v709_v2  ;;  %v65_v47 = vld [vmem:[%s1167_s0 + $0x128] sm:$0xff]  ;;  %v62_v48 = vld [vmem:[%s1167_s0 + $0x110] sm:$0xff]  ;;  %v64_v49 = vld [vmem:[%s1167_s0 + $0x120] sm:$0xff] }
  0x2c   :  { %685 = vmatpush3.bf16.msra.mxu0 %v684_v4  ;;  %711 = vmatprep.subr.bf16.mxu1 %v763_v3  ;;  %v67_v50 = vld [vmem:[%s1167_s0 + $0x138] sm:$0xff]  ;;  %v69_v51 = vld [vmem:[%s1167_s0 + $0x148] sm:$0xff]  ;;  %v66_v52 = vld [vmem:[%s1167_s0 + $0x130] sm:$0xff] }
  0x2d   :  { %687 = vmatprep.subr.bf16.mxu0 %v686_v6  ;;  %v68_v53 = vld [vmem:[%s1167_s0 + $0x140] sm:$0xff]  ;;  %v71_v54 = vld [vmem:[%s1167_s0 + $0x158] sm:$0xff]  ;;  %v73_v55 = vld [vmem:[%s1167_s0 + $0x168] sm:$0xff] }
  0x2e   :  { %v70_v56 = vld [vmem:[%s1167_s0 + $0x150] sm:$0xff]  ;;  %v72_v57 = vld [vmem:[%s1167_s0 + $0x160] sm:$0xff]  ;;  %v75_v58 = vld [vmem:[%s1167_s0 + $0x178] sm:$0xff] }
  0x2f   :  { %713 = vmatpush1.bf16.msra.mxu1 %v712_v10  ;;  %v77_v59 = vld [vmem:[%s1167_s0 + $0x188] sm:$0xff]  ;;  %v74_v60 = vld [vmem:[%s1167_s0 + $0x170] sm:$0xff]  ;;  %v76_v61 = vld [vmem:[%s1167_s0 + $0x180] sm:$0xff] }
  0x30   :  { %689 = vmatpush3.bf16.msra.mxu0 %v688_v11  ;;  %714 = vmatprep.subr.bf16.mxu1 %v763_v3  ;;  %v37_v3 = vld [vmem:[%s1167_s0 + $0x48] sm:$0xff]  ;;  %v79_v62 = vld [vmem:[%s1167_s0 + $0x198] sm:$0xff]  ;;  %v78_v0 = vld [vmem:[%s1167_s0 + $0x190] sm:$0xff] }
  0x31   :  { %v81_v63 = vld [vmem:[%s1167_s0 + $0x1a8] sm:$0xff]  ;;  %v80_v1 = vld [vmem:[%s1167_s0 + $0x1a0] sm:$0xff]  ;;  %v83_v2 = vld [vmem:[%s1167_s0 + $0x1b8] sm:$0xff] }
  0x32   :  { %v85_v4 = vld [vmem:[%s1167_s0 + $0x1c8] sm:$0xff]  ;;  %v82_v5 = vld [vmem:[%s1167_s0 + $0x1b0] sm:$0xff]  ;;  %v84_v6 = vld [vmem:[%s1167_s0 + $0x1c0] sm:$0xff] }
  0x33   :  { %256 = vmatmul.mubr.f32.vlgmr.msra.gmra.mrb[0].mxu0 %v28_v14  ;;  %716 = vmatpush1.bf16.msra.mxu1 %v715_v15  ;;  %v87_v7 = vld [vmem:[%s1167_s0 + $0x1d8] sm:$0xff]  ;;  %v89_v8 = vld [vmem:[%s1167_s0 + $0x1e8] sm:$0xff]  ;;  %v86_v9 = vld [vmem:[%s1167_s0 + $0x1d0] sm:$0xff] }
  0x34   :  { %260 = vmatprep.mubr.f32.mxu0 %v33_v16  ;;  %v88_v10 = vld [vmem:[%s1167_s0 + $0x1e0] sm:$0xff]  ;;  %v91_v11 = vld [vmem:[%s1167_s0 + $0x1f8] sm:$0xff]  ;;  %v90_v12 = vld [vmem:[%s1167_s0 + $0x1f0] sm:$0xff]  ;;  %s513_s0 = sld [smem:[#allocation2]] }
  0x36   :  { %401 = vmatmul.mubr.f32.vlgmr.msra.gmra.mrb[0].mxu1 %v30_v17 }
  0x37   :  { %261 = vmatmul.mubr.f32.gmra.mrb[2].mxu0 %v32_v18  ;;  %559 = vmatprep.mubr.msk.f32.mxu1 %vm142_vm0, %v35_v19 }
  0x38   :  { %265 = vmatprep.mubr.f32.mxu0 %v37_v3 }
  0x3a   :  { %406 = vmatmul.mubr.f32.gmra.mrb[2].mxu1 %v34_v20 }
  0x3b   :  { %266 = vmatmul.mubr.f32.gmra.mrb[4].mxu0 %v36_v21  ;;  %560 = vmatprep.mubr.msk.f32.mxu1 %vm142_vm0, %v39_v22 }
  0x3c   :  { %270 = vmatprep.mubr.f32.mxu0 %v41_v23 }
  0x3e   :  { %411 = vmatmul.mubr.f32.gmra.mrb[4].mxu1 %v38_v24 }
  0x3f   :  { %271 = vmatmul.mubr.f32.gmra.mrb[6].mxu0 %v40_v25  ;;  %561 = vmatprep.mubr.msk.f32.mxu1 %vm142_vm0, %v43_v26 }
  0x40   :  { %275 = vmatprep.mubr.f32.mxu0 %v45_v27 }
  0x42   :  { %416 = vmatmul.mubr.f32.gmra.mrb[6].mxu1 %v42_v28 }
  0x43   :  { %276 = vmatmul.mubr.f32.gmra.mrb[8].mxu0 %v44_v29  ;;  %562 = vmatprep.mubr.msk.f32.mxu1 %vm142_vm0, %v47_v30 }
  0x44   :  { %280 = vmatprep.mubr.f32.mxu0 %v49_v31 }
  0x46   :  { %421 = vmatmul.mubr.f32.gmra.mrb[8].mxu1 %v46_v32 }
  0x47   :  { %281 = vmatmul.mubr.f32.gmra.mrb[10].mxu0 %v48_v33  ;;  %563 = vmatprep.mubr.msk.f32.mxu1 %vm142_vm0, %v51_v34 }
  0x48   :  { %285 = vmatprep.mubr.f32.mxu0 %v53_v35 }
  0x4a   :  { %426 = vmatmul.mubr.f32.gmra.mrb[10].mxu1 %v50_v36 }
  0x4b   :  { %286 = vmatmul.mubr.f32.gmra.mrb[12].mxu0 %v52_v37  ;;  %564 = vmatprep.mubr.msk.f32.mxu1 %vm142_vm0, %v55_v38 }
  0x4c   :  { %290 = vmatprep.mubr.f32.mxu0 %v57_v39 }
  0x4e   :  { %431 = vmatmul.mubr.f32.gmra.mrb[12].mxu1 %v54_v40 }
  0x4f   :  { %291 = vmatmul.mubr.f32.gmra.mrb[14].mxu0 %v56_v41  ;;  %565 = vmatprep.mubr.msk.f32.mxu1 %vm142_vm0, %v59_v42 }
  0x50   :  { %295 = vmatprep.mubr.f32.mxu0 %v61_v43 }
  0x52   :  { %436 = vmatmul.mubr.f32.gmra.mrb[14].mxu1 %v58_v44 }
  0x53   :  { %296 = vmatmul.mubr.f32.gmra.mrb[16].mxu0 %v60_v45  ;;  %566 = vmatprep.mubr.msk.f32.mxu1 %vm142_vm0, %v63_v46 }
  0x54   :  { %300 = vmatprep.mubr.f32.mxu0 %v65_v47 }
  0x56   :  { %441 = vmatmul.mubr.f32.gmra.mrb[16].mxu1 %v62_v48 }
  0x57   :  { %301 = vmatmul.mubr.f32.gmra.mrb[18].mxu0 %v64_v49  ;;  %567 = vmatprep.mubr.msk.f32.mxu1 %vm142_vm0, %v67_v50 }
  0x58   :  { %305 = vmatprep.mubr.f32.mxu0 %v69_v51 }
  0x5a   :  { %446 = vmatmul.mubr.f32.gmra.mrb[18].mxu1 %v66_v52 }
  0x5b   :  { %306 = vmatmul.mubr.f32.gmra.mrb[20].mxu0 %v68_v53  ;;  %568 = vmatprep.mubr.msk.f32.mxu1 %vm142_vm0, %v71_v54 }
  0x5c   :  { %310 = vmatprep.mubr.f32.mxu0 %v73_v55 }
  0x5e   :  { %451 = vmatmul.mubr.f32.gmra.mrb[20].mxu1 %v70_v56 }
  0x5f   :  { %311 = vmatmul.mubr.f32.gmra.mrb[22].mxu0 %v72_v57  ;;  %569 = vmatprep.mubr.msk.f32.mxu1 %vm142_vm0, %v75_v58 }
  0x60   :  { %315 = vmatprep.mubr.f32.mxu0 %v77_v59 }
  0x62   :  { %456 = vmatmul.mubr.f32.gmra.mrb[22].mxu1 %v74_v60 }
  0x63   :  { %316 = vmatmul.mubr.f32.gmra.mrb[24].mxu0 %v76_v61  ;;  %570 = vmatprep.mubr.msk.f32.mxu1 %vm142_vm0, %v79_v62 }
  0x64   :  { %320 = vmatprep.mubr.f32.mxu0 %v81_v63 }
  0x66   :  { %461 = vmatmul.mubr.f32.gmra.mrb[24].mxu1 %v78_v0 }
  0x67   :  { %321 = vmatmul.mubr.f32.gmra.mrb[26].mxu0 %v80_v1  ;;  %571 = vmatprep.mubr.msk.f32.mxu1 %vm142_vm0, %v83_v2 }
  0x68   :  { %325 = vmatprep.mubr.f32.mxu0 %v85_v4 }
  0x6a   :  { %466 = vmatmul.mubr.f32.gmra.mrb[26].mxu1 %v82_v5 }
  0x6b   :  { %326 = vmatmul.mubr.f32.gmra.mrb[28].mxu0 %v84_v6  ;;  %572 = vmatprep.mubr.msk.f32.mxu1 %vm142_vm0, %v87_v7 }
  0x6c   :  { %330 = vmatprep.mubr.f32.mxu0 %v89_v8 }
  0x6e   :  { %471 = vmatmul.mubr.f32.gmra.mrb[28].mxu1 %v86_v9 }
  0x6f   :  { %331 = vmatmul.mubr.f32.gmra.mrb[30].mxu0 %v88_v10  ;;  %573 = vmatprep.mubr.msk.f32.mxu1 %vm142_vm0, %v91_v11 }
  0x72   :  { %476 = vmatmul.mubr.f32.gmra.mrb[30].mxu1 %v90_v12 }
 0x106   :  { %v610_v13 = vpop.f32.mrb[0].mxu0 }
 0x107   :  { %v611_v14 = vpop.f32.mrb[1].mxu0 }
 0x108   :  { %v612_v15 = vadd.f32 %v611_v14, %v610_v13 }
 0x109   :  { %v402_v16 = vpop.f32.mrb[0].mxu1 }
 0x10a   :  { %v613_v17 = vpop.f32.mrb[2].mxu0  ;;  %v404_v18 = vpop.f32.mrb[1].mxu1  ;;  %v403_v3 = vadd.f32 %v612_v15, %v402_v16 }
 0x10b   :  { %v614_v19 = vpop.f32.mrb[3].mxu0 }
 0x10c   :  { %v615_v20 = vadd.f32 %v614_v19, %v613_v17  ;;  %481 = vxpose.xlu0.b32.start [1/16] (narrow) %v403_v3, 8 }
 0x10d   :  { %v407_v21 = vpop.f32.mrb[2].mxu1 }
 0x10e   :  { %v616_v22 = vpop.f32.mrb[4].mxu0  ;;  %v408_v23 = vadd.f32 %v615_v20, %v407_v21  ;;  %v409_v24 = vpop.f32.mrb[3].mxu1 }
 0x10f   :  { %v617_v25 = vpop.f32.mrb[5].mxu0 }
 0x110   :  { %v618_v26 = vadd.f32 %v617_v25, %v616_v22  ;;  %482 = vxpose.xlu0.b32.cont [2/16] (narrow) %v408_v23, 8 }
 0x111   :  { %v412_v27 = vpop.f32.mrb[4].mxu1 }
 0x112   :  { %v619_v28 = vpop.f32.mrb[6].mxu0  ;;  %v413_v29 = vadd.f32 %v618_v26, %v412_v27  ;;  %v414_v30 = vpop.f32.mrb[5].mxu1 }
 0x113   :  { %v620_v31 = vpop.f32.mrb[7].mxu0 }
 0x114   :  { %v621_v32 = vadd.f32 %v620_v31, %v619_v28  ;;  %483 = vxpose.xlu0.b32.cont [3/16] (narrow) %v413_v29, 8 }
 0x115   :  { %v417_v33 = vpop.f32.mrb[6].mxu1 }
 0x116   :  { %v622_v34 = vpop.f32.mrb[8].mxu0  ;;  %v418_v35 = vadd.f32 %v621_v32, %v417_v33  ;;  %v419_v36 = vpop.f32.mrb[7].mxu1 }
 0x117   :  { %v623_v37 = vpop.f32.mrb[9].mxu0 }
 0x118   :  { %v624_v38 = vadd.f32 %v623_v37, %v622_v34  ;;  %484 = vxpose.xlu0.b32.cont [4/16] (narrow) %v418_v35, 8 }
 0x119   :  { %v422_v39 = vpop.f32.mrb[8].mxu1 }
 0x11a   :  { %v625_v40 = vpop.f32.mrb[10].mxu0  ;;  %v423_v41 = vadd.f32 %v624_v38, %v422_v39  ;;  %v424_v42 = vpop.f32.mrb[9].mxu1 }
 0x11b   :  { %v626_v43 = vpop.f32.mrb[11].mxu0 }
 0x11c   :  { %v627_v44 = vadd.f32 %v626_v43, %v625_v40  ;;  %485 = vxpose.xlu0.b32.cont [5/16] (narrow) %v423_v41, 8 }
 0x11d   :  { %v427_v45 = vpop.f32.mrb[10].mxu1 }
 0x11e   :  { %v628_v46 = vpop.f32.mrb[12].mxu0  ;;  %v428_v47 = vadd.f32 %v627_v44, %v427_v45  ;;  %v429_v48 = vpop.f32.mrb[11].mxu1  ;;  %v514_v44 = vstv %s513_s0  ;;  %v518_v45 = vstv %s574_s16 }
 0x11f   :  { %v629_v49 = vpop.f32.mrb[13].mxu0 }
 0x120   :  { %v630_v50 = vadd.f32 %v629_v49, %v628_v46  ;;  %486 = vxpose.xlu0.b32.cont [6/16] (narrow) %v428_v47, 8  ;;  %v525_v49 = vstv %s576_s17 }
 0x121   :  { %v432_v51 = vpop.f32.mrb[12].mxu1 }
 0x122   :  { %v631_v52 = vpop.f32.mrb[14].mxu0  ;;  %v433_v53 = vadd.f32 %v630_v50, %v432_v51  ;;  %v434_v54 = vpop.f32.mrb[13].mxu1 }
 0x123   :  { %v632_v55 = vpop.f32.mrb[15].mxu0 }
 0x124   :  { %v633_v56 = vadd.f32 %v632_v55, %v631_v52  ;;  %487 = vxpose.xlu0.b32.cont [7/16] (narrow) %v433_v53, 8  ;;  %v522_v52 = vstv %s575_s18 }
 0x125   :  { %v437_v57 = vpop.f32.mrb[14].mxu1 }
 0x126   :  { %v634_v58 = vpop.f32.mrb[16].mxu0  ;;  %v438_v59 = vadd.f32 %v633_v56, %v437_v57  ;;  %v439_v60 = vpop.f32.mrb[15].mxu1  ;;  %v532_v56 = vstv %s577_s19 }
 0x127   :  { %v635_v61 = vpop.f32.mrb[17].mxu0 }
 0x128   :  { %v636_v62 = vadd.f32 %v635_v61, %v634_v58  ;;  %488 = vxpose.xlu0.b32.cont [8/16] (narrow) %v438_v59, 8 }
 0x129   :  { %v442_v63 = vpop.f32.mrb[16].mxu1 }
 0x12a   :  { %v637_v0 = vpop.f32.mrb[18].mxu0  ;;  %v443_v1 = vadd.f32 %v636_v62, %v442_v63  ;;  %v444_v2 = vpop.f32.mrb[17].mxu1 }
 0x12b   :  { %v638_v4 = vpop.f32.mrb[19].mxu0 }
 0x12c   :  { %v639_v5 = vadd.f32 %v638_v4, %v637_v0  ;;  %489 = vxpose.xlu0.b32.cont [9/16] (narrow) %v443_v1, 8 }
 0x12d   :  { %v447_v6 = vpop.f32.mrb[18].mxu1 }
 0x12e   :  { %v640_v7 = vpop.f32.mrb[20].mxu0  ;;  %v448_v8 = vadd.f32 %v639_v5, %v447_v6  ;;  %v449_v9 = vpop.f32.mrb[19].mxu1 }
 0x12f   :  { %v641_v10 = vpop.f32.mrb[21].mxu0 }
 0x130   :  { %v642_v11 = vadd.f32 %v641_v10, %v640_v7  ;;  %490 = vxpose.xlu0.b32.cont [10/16] (narrow) %v448_v8, 8 }
 0x131   :  { %v452_v12 = vpop.f32.mrb[20].mxu1 }
 0x132   :  { %v643_v13 = vpop.f32.mrb[22].mxu0  ;;  %v453_v14 = vadd.f32 %v642_v11, %v452_v12  ;;  %v454_v15 = vpop.f32.mrb[21].mxu1 }
 0x133   :  { %v644_v16 = vpop.f32.mrb[23].mxu0 }
 0x134   :  { %v645_v17 = vadd.f32 %v644_v16, %v643_v13  ;;  %491 = vxpose.xlu0.b32.cont [11/16] (narrow) %v453_v14, 8 }
 0x135   :  { %v457_v18 = vpop.f32.mrb[22].mxu1 }
 0x136   :  { %v646_v19 = vpop.f32.mrb[24].mxu0  ;;  %v458_v3 = vadd.f32 %v645_v17, %v457_v18  ;;  %v459_v20 = vpop.f32.mrb[23].mxu1 }
 0x137   :  { %v647_v21 = vpop.f32.mrb[25].mxu0 }
 0x138   :  { %v648_v22 = vadd.f32 %v647_v21, %v646_v19  ;;  %492 = vxpose.xlu0.b32.cont [12/16] (narrow) %v458_v3, 8 }
 0x139   :  { %v462_v23 = vpop.f32.mrb[24].mxu1 }
 0x13a   :  { %v649_v24 = vpop.f32.mrb[26].mxu0  ;;  %v463_v25 = vadd.f32 %v648_v22, %v462_v23  ;;  %v464_v26 = vpop.f32.mrb[25].mxu1 }
 0x13b   :  { %v650_v27 = vpop.f32.mrb[27].mxu0 }
 0x13c   :  { %v651_v28 = vadd.f32 %v650_v27, %v649_v24  ;;  %493 = vxpose.xlu0.b32.cont [13/16] (narrow) %v463_v25, 8 }
 0x13d   :  { %v467_v29 = vpop.f32.mrb[26].mxu1 }
 0x13e   :  { %v652_v30 = vpop.f32.mrb[28].mxu0  ;;  %v468_v31 = vadd.f32 %v651_v28, %v467_v29  ;;  %v469_v32 = vpop.f32.mrb[27].mxu1 }
 0x13f   :  { %v653_v33 = vpop.f32.mrb[29].mxu0 }
 0x140   :  { %v654_v34 = vadd.f32 %v653_v33, %v652_v30  ;;  %494 = vxpose.xlu0.b32.cont [14/16] (narrow) %v468_v31, 8 }
 0x141   :  { %v472_v35 = vpop.f32.mrb[28].mxu1 }
 0x142   :  { %v655_v36 = vpop.f32.mrb[30].mxu0  ;;  %v473_v37 = vadd.f32 %v654_v34, %v472_v35  ;;  %v474_v38 = vpop.f32.mrb[29].mxu1 }
 0x143   :  { %v656_v39 = vpop.f32.mrb[31].mxu0 }
 0x144   :  { %v657_v40 = vadd.f32 %v656_v39, %v655_v36  ;;  %495 = vxpose.xlu0.b32.cont [15/16] (narrow) %v473_v37, 8 }
 0x145   :  { %v477_v41 = vpop.f32.mrb[30].mxu1 }
 0x146   :  { %v478_v42 = vadd.f32 %v657_v40, %v477_v41  ;;  %v479_v43 = vpop.f32.mrb[31].mxu1 }
 0x148   :  { %496 = vxpose.xlu0.b32.end [16/16] (narrow) %v478_v42, 8 }
 0x18c   :  { %v497_v46 = vpop.trf.xlu0 }
 0x18d   :  { %v515_v47 = vadd.f32 %v514_v44, %v497_v46  ;;  %v519_v48 = vadd.f32 %v518_v45, %v497_v46 }
 0x18f   :  { %v516_v50 = vmax.f32 %v515_v47, 0.0  ;;  %v520_v51 = vmax.f32 %v519_v48, 0.0 }
 0x191   :  { %v526_v53 = vmul.f32 %v525_v49, %v520_v51  ;;  %v523_v54 = vmul.f32 %v522_v52, %v516_v50 }
 0x193   :  { %v528_v55 = vrot.slane %v526_v53, 1 }
 0x195   :  { %v530_v57 = vadd.f32 %v528_v55, %v523_v54 }
 0x197   :  { %v533_v58 = vadd.f32 %v532_v56, %v530_v57 }
 0x199   :  { %v534_v59 = vsub.f32 0.0, %v533_v58 }
 0x19b   :  { %v535_v60 = vmul.f32 1.442695, %v534_v59 }
 0x19d   :  { %720 = vpow2.f32 %v535_v60 }
 0x1a7   :  { %v721_v61 = vpop.eup %720 }
 0x1a8   :  { %v537_v62 = vadd.f32 1.0, %v721_v61 }
 0x1aa   :  { %722 = vrcp.f32 %v537_v62 }
 0x1b4   :  { %v723_v63 = vpop.eup %722 }
 0x1b5   :  { %540 = vst [vmem:[#allocation5] sm:$0x1] %v723_v63  ;;  %v541_v0 = vsub.f32 1.0, %v723_v63 }
 0x1b7   :  { %542 = vst [vmem:[#allocation5 + $0x1] sm:$0x1] %v541_v0 }
 0x1b8   :  { %747 = shalt.err (!%p744_p9)
}
 0x1b9   :  { %s748_s24 = scalar_lea.hbm %s1170_s3, 32 }
 0x1ba   :  { %p749_p10 = scmp.ne.s32.totalorder %s1170_s3, %s748_s24  ;;  %p752_p11 = scmp.lt.u32.totalorder %s748_s24, %s1170_s3 }
 0x1bc   :  { %p754_p12 = pnand %p752_p11, %p749_p10 }
 0x1be   :  { %757 = shalt.err (!%p754_p12)
}
 0x1bf   :  { %552 = dma.vmem_to_hbm [thread:$0]  %s550_s2, 32, %s1170_s3, [#allocation3]  }
 0x1c0   :  { %760 = dma.done.wait [#allocation3], 32  }
 0x1c1   :  { %761 = vsyncadd [#allocation3], 4294967264 }
 0x1c2   :  { %556 = vsyncpa [#allocation3], 1 }
 0x1c3   :  { %557 = vsyncpa [#allocation4], 1 }

</bundles_post_ra>
